<compile_context>
chip_gen: v5e
topology: v5e:2x2
jax: 0.10.0
libtpu: 0.0.40
codegen_flags: <defaults>
</compile_context>

<pallas_src>
import functools

import jax
import jax.numpy as jnp
from jax.experimental import pallas as pl
from jax.experimental.pallas import tpu as pltpu


LANE = 128  # TPU lane width; the fused single-step output slab is padded to it.


# ---------------------------------------------------------------------------
# Kernels
# ---------------------------------------------------------------------------
def rnn_step_kernel(x_ref, h_ref, w_ih_ref, w_hh_ref, b_rnn_ref,
                    w_fc_ref, b_fc_ref, slab_ref, *, size_middle):
    """Fused single-step RNNCell + Linear.

    x_ref    : (B, size_in)             f32
    h_ref    : (B, H)                   f32
    w_ih_ref : (size_in, H)             matmul dtype (W_ih^T)
    w_hh_ref : (H, H)                   matmul dtype (W_hh^T)
    b_rnn_ref: (1, H)                   f32  (b_ih + b_hh)
    w_fc_ref : (H, SLAB - H)            f32  [W_fc^T | 0]
    b_fc_ref : (1, SLAB - H)            f32  [b_fc   | 0]
    slab_ref : (B, SLAB)                f32  [h_new | out | 0]   (SLAB = 128)
    """
    # Cast MXU operands in-kernel to the weights' dtype (f32 by default).
    x = x_ref[...].astype(w_ih_ref.dtype)
    h = h_ref[...].astype(w_hh_ref.dtype)

    pre = (jnp.dot(x, w_ih_ref[...], preferred_element_type=jnp.float32)
           + jnp.dot(h, w_hh_ref[...], preferred_element_type=jnp.float32)
           + b_rnn_ref[...])
    h_new = jnp.tanh(pre)                                       # (B, H) f32

    # h_new goes straight into the first H lanes (masked vst into the VMEM
    # tile; HBM writeback is still the single dense (B, 128) block).
    slab_ref[:, :size_middle] = h_new
    slab_ref[:, size_middle:] = (
        jnp.dot(h_new, w_fc_ref[...], preferred_element_type=jnp.float32)
        + b_fc_ref[...])


def rnn_seq_kernel(x_ref, h0_ref, w_ih_ref, w_hh_ref, b_rnn_ref,
                   w_fc_ref, b_fc_ref, out_ref, h_last_ref, h_scratch):
    """Sequence-fused variant: one grid step == one time step.

    x_ref    : (1, B, size_in)   per-step input block
    h0_ref   : (B, H)            initial hidden state (read at t == 0)
    weights  : resident in VMEM (constant index_maps)
    out_ref  : (1, B, size_out)  per-step output block
    h_last_ref:(B, H)            final hidden state (constant block index)
    h_scratch: (B, H) f32        hidden state carried across grid steps
    """
    t = pl.program_id(0)

    @pl.when(t == 0)
    def _():
        h_scratch[...] = h0_ref[...].astype(h_scratch.dtype)

    x = x_ref[0].astype(w_ih_ref.dtype)
    h = h_scratch[...].astype(w_hh_ref.dtype)

    pre = (jnp.dot(x, w_ih_ref[...], preferred_element_type=jnp.float32)
           + jnp.dot(h, w_hh_ref[...], preferred_element_type=jnp.float32)
           + b_rnn_ref[...])
    h_new = jnp.tanh(pre)                                       # (B, H) f32

    h_scratch[...] = h_new
    out_ref[0] = (jnp.dot(h_new, w_fc_ref[...],
                          preferred_element_type=jnp.float32)
                  + b_fc_ref[...]).astype(out_ref.dtype)
    h_last_ref[...] = h_new.astype(h_last_ref.dtype)


# ---------------------------------------------------------------------------
# One-time parameter preparation
# ---------------------------------------------------------------------------
def prepare_params(w_ih, w_hh, b_ih, b_hh, w_fc, b_fc,
                   matmul_dtype=jnp.float32):
    """Hoisted weight prep (transpose / pad / bias fusion), done once."""
    size_middle, size_in = w_ih.shape
    size_out = w_fc.shape[0]
    slab_width = int(pl.cdiv(size_middle + size_out, LANE)) * LANE
    pad = slab_width - size_middle          # width of the FC-projection lanes

    w_ih_t = w_ih.T.astype(matmul_dtype)                     # (size_in, H)
    w_hh_t = w_hh.T.astype(matmul_dtype)                     # (H, H)
    b_rnn = (b_ih + b_hh).reshape(1, size_middle).astype(jnp.float32)

    # Lane-padded FC projection for the single-step slab output (f32: exact).
    w_fc_pad = jnp.zeros((size_middle, pad), jnp.float32)
    w_fc_pad = w_fc_pad.at[:, :size_out].set(w_fc.T.astype(jnp.float32))
    b_fc_pad = jnp.zeros((1, pad), jnp.float32)
    b_fc_pad = b_fc_pad.at[0, :size_out].set(b_fc.astype(jnp.float32))

    # Unpadded FC projection for the sequence-fused variant.
    w_fc_t = w_fc.T.astype(jnp.float32)                      # (H, size_out)
    b_fc_row = b_fc.reshape(1, size_out).astype(jnp.float32)

    return {
        "w_ih_t": w_ih_t, "w_hh_t": w_hh_t, "b_rnn": b_rnn,
        "w_fc_pad": w_fc_pad, "b_fc_pad": b_fc_pad,
        "w_fc_t": w_fc_t, "b_fc_row": b_fc_row,
        "dims": (size_in, size_middle, size_out, slab_width),
    }


# ---------------------------------------------------------------------------
# Wrappers
# ---------------------------------------------------------------------------
def simple_model_forward(x, hx, prepared):
    """One forward step (matches Simple_Model.forward). Returns (out, h_new)."""
    size_in, H, size_out, slab_width = prepared["dims"]
    B = x.shape[0]

    vmem = pl.BlockSpec(memory_space=pltpu.MemorySpace.VMEM)
    slab = pl.pallas_call(
        functools.partial(rnn_step_kernel, size_middle=H),
        out_shape=jax.ShapeDtypeStruct((B, slab_width), jnp.float32),
        in_specs=[vmem] * 7,
        out_specs=vmem,
    )(x, hx, prepared["w_ih_t"], prepared["w_hh_t"], prepared["b_rnn"],
      prepared["w_fc_pad"], prepared["b_fc_pad"])

    h_new = slab[:, :H]
    out = slab[:, H:H + size_out]
    return out, h_new


def simple_model_forward_seq(xs, hx, prepared):
    """Run T steps of the cell in ONE pallas_call (grid over time).

    xs: (T, B, size_in). Returns (outs (T, B, size_out), h_last (B, H)).
    """
    size_in, H, size_out, _ = prepared["dims"]
    T, B, _ = xs.shape
    w_ih_t, w_hh_t = prepared["w_ih_t"], prepared["w_hh_t"]
    b_rnn = prepared["b_rnn"]
    w_fc_t, b_fc_row = prepared["w_fc_t"], prepared["b_fc_row"]

    def const2(_t):
        return (0, 0)

    outs, h_last = pl.pallas_call(
        rnn_seq_kernel,
        grid=(T,),
        out_shape=(jax.ShapeDtypeStruct((T, B, size_out), jnp.float32),
                   jax.ShapeDtypeStruct((B, H), jnp.float32)),
        in_specs=[
            pl.BlockSpec((1, B, size_in), lambda t: (t, 0, 0)),   # x_t
            pl.BlockSpec((B, H), const2),                         # h0
            pl.BlockSpec(w_ih_t.shape, const2),                   # weights:
            pl.BlockSpec(w_hh_t.shape, const2),                   #  constant
            pl.BlockSpec(b_rnn.shape, const2),                    #  index_map
            pl.BlockSpec(w_fc_t.shape, const2),                   #  -> resident
            pl.BlockSpec(b_fc_row.shape, const2),                 #  in VMEM
        ],
        out_specs=(
            pl.BlockSpec((1, B, size_out), lambda t: (t, 0, 0)),  # per-step out
            pl.BlockSpec((B, H), const2),                         # final hidden
        ),
        scratch_shapes=[pltpu.VMEM((B, H), jnp.float32)],         # carried h
        compiler_params=pltpu.CompilerParams(
            dimension_semantics=("arbitrary",)),                  # serial recurrence
    )(xs, hx, w_ih_t, w_hh_t, b_rnn, w_fc_t, b_fc_row)
    return outs, h_last


# ---------------------------------------------------------------------------
# Deterministic init mimicking PyTorch uniform(-1/sqrt(fan), 1/sqrt(fan))
# ---------------------------------------------------------------------------
def init_params(key, size_in, size_middle, size_out):
    ks = jax.random.split(key, 6)
    k_rnn = 1.0 / jnp.sqrt(size_middle)
    k_fc = 1.0 / jnp.sqrt(size_middle)
    w_ih = jax.random.uniform(ks[0], (size_middle, size_in), jnp.float32, -k_rnn, k_rnn)
    w_hh = jax.random.uniform(ks[1], (size_middle, size_middle), jnp.float32, -k_rnn, k_rnn)
    b_ih = jax.random.uniform(ks[2], (size_middle,), jnp.float32, -k_rnn, k_rnn)
    b_hh = jax.random.uniform(ks[3], (size_middle,), jnp.float32, -k_rnn, k_rnn)
    w_fc = jax.random.uniform(ks[4], (size_out, size_middle), jnp.float32, -k_fc, k_fc)
    b_fc = jax.random.uniform(ks[5], (size_out,), jnp.float32, -k_fc, k_fc)
    return w_ih, w_hh, b_ih, b_hh, w_fc, b_fc


if __name__ == "__main__":
    size_in, size_middle, size_out, batch = 16, 32, 3, 10   # module defaults
    seq_len = 8

    key = jax.random.PRNGKey(0)
    k_params, k_x, k_seq = jax.random.split(key, 3)
    w_ih, w_hh, b_ih, b_hh, w_fc, b_fc = init_params(
        k_params, size_in, size_middle, size_out)

    # One-time parameter preparation (f32 MXU operands by default: v5e-safe,
    # and exact vs the PyTorch f32 reference).
    prepared = prepare_params(w_ih, w_hh, b_ih, b_hh, w_fc, b_fc,
                              matmul_dtype=jnp.float32)

    x = jax.random.normal(k_x, (batch, size_in), jnp.float32)
    hx = jnp.zeros((batch, size_middle), jnp.float32)        # self.hx = zeros

    # ---- single step (exact semantics of Simple_Model.forward) ----
    out, h_new = simple_model_forward(x, hx, prepared)
    jax.block_until_ready((out, h_new))
    assert out.shape == (batch, size_out)
    assert h_new.shape == (batch, size_middle)

    hp = jax.lax.Precision.HIGHEST
    h_ref = jnp.tanh(jnp.dot(x, w_ih.T, precision=hp) + b_ih
                     + jnp.dot(hx, w_hh.T, precision=hp) + b_hh)
    out_ref = jnp.dot(h_ref, w_fc.T, precision=hp) + b_fc
    assert jnp.allclose(h_new, h_ref, atol=1e-3, rtol=1e-3), "hidden mismatch"
    assert jnp.allclose(out, out_ref, atol=1e-3, rtol=1e-3), "output mismatch"

    # ---- sequence-fused variant (time loop inside one pallas_call) ----
    xs = jax.random.normal(k_seq, (seq_len, batch, size_in), jnp.float32)
    outs, h_last = simple_model_forward_seq(xs, hx, prepared)
    jax.block_until_ready((outs, h_last))
    assert outs.shape == (seq_len, batch, size_out)
    assert h_last.shape == (batch, size_middle)

    h = hx
    outs_ref = []
    for t in range(seq_len):
        h = jnp.tanh(jnp.dot(xs[t], w_ih.T, precision=hp) + b_ih
                     + jnp.dot(h, w_hh.T, precision=hp) + b_hh)
        outs_ref.append(jnp.dot(h, w_fc.T, precision=hp) + b_fc)
    outs_ref = jnp.stack(outs_ref)
    assert jnp.allclose(outs, outs_ref, atol=1e-3, rtol=1e-3), "seq out mismatch"
    assert jnp.allclose(h_last, h, atol=1e-3, rtol=1e-3), "seq hidden mismatch"

    print("KERNEL_OK")
</pallas_src>

<mosaic_0001>
module attributes {stable_mosaic.version = 11 : i64} {
  func.func @rnn_step_kernel(%arg0: memref<10x16xf32, #tpu.memory_space<vmem>>, %arg1: memref<10x32xf32, #tpu.memory_space<vmem>>, %arg2: memref<16x32xf32, #tpu.memory_space<vmem>>, %arg3: memref<32x32xf32, #tpu.memory_space<vmem>>, %arg4: memref<1x32xf32, #tpu.memory_space<vmem>>, %arg5: memref<32x96xf32, #tpu.memory_space<vmem>>, %arg6: memref<1x96xf32, #tpu.memory_space<vmem>>, %arg7: memref<10x128xf32, #tpu.memory_space<vmem>>) attributes {dimension_semantics = [], scalar_prefetch = 0 : i64, scratch_operands = 0 : i64, tpu.core_type = #tpu.core_type<tc>} {
    %c0 = arith.constant 0 : index
    %c0_0 = arith.constant 0 : index
    %0 = vector.load %arg0[%c0, %c0_0] : memref<10x16xf32, #tpu.memory_space<vmem>>, vector<10x16xf32>
    %c0_1 = arith.constant 0 : index
    %c0_2 = arith.constant 0 : index
    %1 = vector.load %arg1[%c0_1, %c0_2] : memref<10x32xf32, #tpu.memory_space<vmem>>, vector<10x32xf32>
    %c0_3 = arith.constant 0 : index
    %c0_4 = arith.constant 0 : index
    %2 = vector.load %arg2[%c0_3, %c0_4] : memref<16x32xf32, #tpu.memory_space<vmem>>, vector<16x32xf32>
    %cst = arith.constant dense<0.000000e+00> : vector<10x32xf32>
    %3 = tpu.matmul %0, %2, %cst {dimension_numbers = #tpu.dot_dimension_numbers<[1], [0], [0], [1], [0, 0, 1, 1], [], []>} : vector<10x16xf32>, vector<16x32xf32>, vector<10x32xf32> -> vector<10x32xf32>
    %c0_5 = arith.constant 0 : index
    %c0_6 = arith.constant 0 : index
    %4 = vector.load %arg3[%c0_5, %c0_6] : memref<32x32xf32, #tpu.memory_space<vmem>>, vector<32x32xf32>
    %cst_7 = arith.constant dense<0.000000e+00> : vector<10x32xf32>
    %5 = tpu.matmul %1, %4, %cst_7 {dimension_numbers = #tpu.dot_dimension_numbers<[1], [0], [0], [1], [0, 0, 1, 1], [], []>} : vector<10x32xf32>, vector<32x32xf32>, vector<10x32xf32> -> vector<10x32xf32>
    %6 = arith.addf %3, %5 : vector<10x32xf32>
    %c0_8 = arith.constant 0 : index
    %c0_9 = arith.constant 0 : index
    %7 = vector.load %arg4[%c0_8, %c0_9] : memref<1x32xf32, #tpu.memory_space<vmem>>, vector<1x32xf32>
    %8 = vector.broadcast %7 : vector<1x32xf32> to vector<10x32xf32>
    %9 = arith.addf %6, %8 : vector<10x32xf32>
    %10 = math.tanh %9 : vector<10x32xf32>
    %c0_10 = arith.constant 0 : index
    %c0_11 = arith.constant 0 : index
    %11 = vector.load %arg7[%c0_10, %c0_11] : memref<10x128xf32, #tpu.memory_space<vmem>>, vector<10x32xf32>
    tpu.vector_store %arg7[%c0_10, %c0_11], %10 {strides = array<i32>} : memref<10x128xf32, #tpu.memory_space<vmem>>, vector<10x32xf32>,
    %c0_12 = arith.constant 0 : index
    %c0_13 = arith.constant 0 : index
    %12 = vector.load %arg5[%c0_12, %c0_13] : memref<32x96xf32, #tpu.memory_space<vmem>>, vector<32x96xf32>
    %cst_14 = arith.constant dense<0.000000e+00> : vector<10x96xf32>
    %13 = tpu.matmul %10, %12, %cst_14 {dimension_numbers = #tpu.dot_dimension_numbers<[1], [0], [0], [1], [0, 0, 1, 1], [], []>} : vector<10x32xf32>, vector<32x96xf32>, vector<10x96xf32> -> vector<10x96xf32>
    %c0_15 = arith.constant 0 : index
    %c0_16 = arith.constant 0 : index
    %14 = vector.load %arg6[%c0_15, %c0_16] : memref<1x96xf32, #tpu.memory_space<vmem>>, vector<1x96xf32>
    %15 = vector.broadcast %14 : vector<1x96xf32> to vector<10x96xf32>
    %16 = arith.addf %13, %15 : vector<10x96xf32>
    %c0_17 = arith.constant 0 : index
    %c32 = arith.constant 32 : index
    %17 = vector.load %arg7[%c0_17, %c32] : memref<10x128xf32, #tpu.memory_space<vmem>>, vector<10x96xf32>
    tpu.vector_store %arg7[%c0_17, %c32], %16 {strides = array<i32>} : memref<10x128xf32, #tpu.memory_space<vmem>>, vector<10x96xf32>,
    return
  }
}

</mosaic_0001>

<bundles_post_ra>
// kernel: tpu_custom_call.1
= control target key start
LH: loop header
LB: loop body
LE: loop exit
PB: predicated region body
PF: predicated region fallthrough
CT: control target
= control target key end

     0   :  { %12 = vsyncpa [#allocation3], 0  ;;  %s529_s0 = inlined_call_operand.hbm [shape: f32[10,16], index: 0, kind: input, shape index: {}]   ;;  %s530_s1 = inlined_call_operand.hbm [shape: f32[10,32], index: 1, kind: input, shape index: {}]   ;;  %s531_s2 = inlined_call_operand.hbm [shape: f32[16,32], index: 2, kind: input, shape index: {}]   ;;  %s532_s3 = inlined_call_operand.hbm [shape: f32[32,32], index: 3, kind: input, shape index: {}]   ;;  %s533_s4 = inlined_call_operand.vmem [shape: f32[1,32], index: 4, kind: input, shape index: {}]   ;;  %s534_s5 = inlined_call_operand.hbm [shape: f32[32,96], index: 5, kind: input, shape index: {}]   ;;  %s535_s6 = inlined_call_operand.vmem [shape: f32[1,96], index: 6, kind: input, shape index: {}]   ;;  %s536_s7 = inlined_call_operand.hbm [shape: f32[10,128], index: 7, kind: output, shape index: {}]  }
   0x1   :  { %13 = vsyncpa [#allocation6], 0 }
   0x2   :  { %14 = vsyncpa [#allocation9], 0 }
   0x3   :  { %15 = vsyncpa [#allocation4], 0  ;;  %s33_s26 = sshll.u32 %s530_s1, 4  ;;  %s433_s27 = smov [#allocation5]   ;;  %s34_s26 = int_to_ptr.hbm [resolvable:$true] %s33_s26 }
   0x4   :  { %s35_s28 = sshll.u32 %s433_s27, 4  ;;  %s59_s8 = sshll.u32 %s532_s3, 4  ;;  %s36_s28 = int_to_ptr.vmem [resolvable:$true] %s35_s28  ;;  %s60_s8 = int_to_ptr.hbm [resolvable:$true] %s59_s8 }
   0x5   :  { %s434_s9 = smov 128   ;;  %s435_s10 = smov 8  }
   0x6   :  { %41 = dma.hbm_to_vmem [thread:$0]  %s34_s26, 256, %s36_s28, [#allocation6], %s434_s9, %s434_s9, %s435_s10  }
   0x7   :  { %s436_s11 = smov [#allocation8]   ;;  %s20_s1 = sshll.u32 %s529_s0, 4  ;;  %s21_s1 = int_to_ptr.hbm [resolvable:$true] %s20_s1 }
   0x8   :  { %s61_s12 = sshll.u32 %s436_s11, 4  ;;  %s46_s16 = sshll.u32 %s531_s2, 4  ;;  %s62_s12 = int_to_ptr.vmem [resolvable:$true] %s61_s12  ;;  %s47_s16 = int_to_ptr.hbm [resolvable:$true] %s46_s16 }
   0x9   :  { %67 = dma.hbm_to_vmem [thread:$0]  %s60_s8, 512, %s62_s12, [#allocation9], %s434_s9, %s434_s9, %s435_s10  }
   0xa   :  { %s437_s17 = smov [#allocation2]   ;;  %s438_s19 = smov [#allocation7]  }
   0xb   :  { %s22_s18 = sshll.u32 %s437_s17, 4  ;;  %s48_s0 = sshll.u32 %s438_s19, 4  ;;  %s23_s18 = int_to_ptr.vmem [resolvable:$true] %s22_s18  ;;  %s49_s0 = int_to_ptr.vmem [resolvable:$true] %s48_s0 }
   0xc   :  { %28 = dma.hbm_to_vmem [thread:$0]  %s21_s1, 256, %s23_s18, [#allocation3], %s434_s9, %s434_s9, %s435_s10  }
   0xd   :  { %s74_s22 = sshll.u32 %s534_s5, 4  ;;  %s439_s2 = smov [#allocation10]   ;;  %s75_s22 = int_to_ptr.hbm [resolvable:$true] %s74_s22 }
   0xe   :  { %54 = dma.hbm_to_vmem [thread:$0]  %s47_s16, 256, %s49_s0, [#allocation6], %s434_s9, %s434_s9, %s435_s10  }
   0xf   :  { %s76_s23 = sshll.u32 %s439_s2, 4  ;;  %s77_s23 = int_to_ptr.vmem [resolvable:$true] %s76_s23 }
  0x10   :  { %82 = dma.hbm_to_vmem [thread:$0]  %s75_s22, 512, %s77_s23, [#allocation9], %s434_s9, %s434_s9, %s435_s10  }
  0x11   :  { %425 = dma.done.wait [#allocation3], 256  }
  0x12   :  { %426 = vsyncadd [#allocation3], 4294967040 }
  0x13   :  { %427 = dma.done.wait [#allocation6], 512  }
  0x14   :  { %428 = vsyncadd [#allocation6], 4294966784 }
  0x15   :  { %429 = dma.done.wait [#allocation9], 1024  }
  0x16   :  { %430 = vsyncadd [#allocation9], 4294966272  ;;  %v114_v0 = vld [vmem:[#allocation8 + $0x18] sm:$0xff]  ;;  %v113_v1 = vld [vmem:[#allocation8 + $0x10] sm:$0xff]  ;;  %vm145_vm0 = vcmask 130048   ;;  %vm115_vm1 = vcmask 261120  }
  0x17   :  { %134 = vmatpush.msra.mxu0 %v114_v0  ;;  %262 = vmatpush.msra.mxu3 %v114_v0  ;;  %v110_v2 = vld [vmem:[#allocation7 + $0x8] sm:$0xff]  ;;  %v109_v3 = vld [vmem:[#allocation7] sm:$0xff]  ;;  %v112_v4 = vld [vmem:[#allocation8 + $0x8] sm:$0xff]  ;;  %vm184_vm2 = vcmask 254976   ;;  %s440_s26 = smov 32   ;;  %vm231_vm3 = vcmask 1047808  }
  0x18   :  { %166 = vmatpush.msra.mxu1 %v110_v2  ;;  %v105_v5 = vld [vmem:[#allocation2] sm:$0xff]  ;;  %v111_v6 = vld [vmem:[#allocation8] sm:$0xff]  ;;  %v108_v8 = vld [vmem:[#allocation5 + $0x8] sm:$0x3]  ;;  %s441_s27 = smov [#allocation11]   ;;  %s241_s8 = sshll.u32 %s536_s7, 4  ;;  %s242_s8 = int_to_ptr.hbm [resolvable:$true] %s241_s8 }
  0x19   :  { %135 = vmatpush.msra.mxu0 %v113_v1  ;;  %263 = vmatpush.msra.mxu3 %v113_v1  ;;  %v107_v7 = vld [vmem:[#allocation5] sm:$0xff]  ;;  %v106_v9 = vld [vmem:[#allocation2 + $0x8] sm:$0x3]  ;;  %v188_v11 = vld [vmem:[#allocation10 + $0x10] sm:$0xff]  ;;  %s239_s28 = sshll.u32 %s441_s27, 4  ;;  %vm233_vm4 = vcmask 1041664   ;;  %s240_s28 = int_to_ptr.vmem [resolvable:$true] %s239_s28 }
  0x1a   :  { %167 = vmatpush.msra.mxu1 %v109_v3  ;;  %v189_v10 = vld [vmem:[#allocation10 + $0x18] sm:$0xff]  ;;  %v187_v12 = vld [vmem:[#allocation10 + $0x8] sm:$0xff]  ;;  %v186_v13 = vld [vmem:[#allocation10] sm:$0xff] }
  0x1b   :  { %136 = vmatpush.msra.mxu0 %v112_v4  ;;  %264 = vmatpush.msra.mxu3 %v112_v4  ;;  %v275_v15 = vld [vmem:[%s533_s4] ss:$0 sm:$0xff] }
  0x1c   :  { %258 = vmatmul.msk.f32.vlgmr.msra.gmra.mxu1 %vm145_vm0, %v105_v5  ;;  %212 = vmatpush.msra.mxu2 %v189_v10  ;;  %v276_v25 = vld [vmem:[%s535_s6] ss:$0 sm:$0xff] }
  0x1d   :  { %137 = vmatpush.msra.mxu0 %v111_v6  ;;  %265 = vmatpush.msra.mxu3 %v111_v6 }
  0x1e   :  { %256 = vmatmul.msk.f32.vlgmr.msra.gmra.mxu0 %vm115_vm1, %v107_v7  ;;  %257 = vmatmul.msk.f32.vlgmr.msra.gmra.mxu3 %vm115_vm1, %v108_v8 }
  0x1f   :  { %213 = vmatpush.msra.mxu2 %v188_v11 }
  0x21   :  { %214 = vmatpush.msra.mxu2 %v187_v12 }
  0x23   :  { %215 = vmatpush.msra.mxu2 %v186_v13 }
  0x24   :  { %259 = vmatmul.msk.f32.gmra.mxu1 %vm145_vm0, %v106_v9 }
  0x99   :  { %v169_v14 = vpop.f32.mrf.mxu1 }
  0x9b   :  { %v139_v16 = vpop.f32.mrf.mxu0 }
  0x9c   :  { %v170_v17 = vadd.f32 %v169_v14, %v139_v16 }
  0x9e   :  { %v179_v18 = vadd.f32 %v275_v15, %v170_v17 }
  0xa0   :  { %277 = vtanh.f32 %v179_v18 }
  0xa1   :  { %v142_v19 = vpop.f32.mrf.mxu3  ;;  %v172_v20 = vpop.f32.mrf.mxu1 }
  0xa2   :  { %v173_v21 = vadd.f32 %v172_v20, %v142_v19 }
  0xa4   :  { %v180_v22 = vadd.f32 %v275_v15, %v173_v21 }
  0xa6   :  { %v278_v23 = vpop.eup %277  ;;  %279 = vtanh.f32 %v180_v22 }
  0xa7   :  { %183 = vst.msk [vmem:[#allocation11] sm:$0xff] %vm115_vm1, %v278_v23  ;;  %260 = vmatmul.msk.f32.vlgmr.msra.gmra.mxu2 %vm115_vm1, %v278_v23 }
  0xac   :  { %v280_v24 = vpop.eup %279 }
  0xad   :  { %185 = vst.msk [vmem:[#allocation11 + $0x8] sm:$0x3] %vm184_vm2, %v280_v24 }
  0xaf   :  { %261 = vmatmul.msk.f32.gmra.mxu2 %vm115_vm1, %v280_v24 }
 0x12a   :  { %v217_v26 = vpop.f32.mrf.mxu2 }
 0x12b   :  { %v218_v27 = vadd.f32 %v276_v25, %v217_v26 }
 0x12d   :  { %225 = vrot.lane.b32.xlu0 %v218_v27, %s440_s26 }
 0x132   :  { %v220_v28 = vpop.f32.mrf.mxu2 }
 0x133   :  { %v221_v29 = vadd.f32 %v276_v25, %v220_v28 }
 0x135   :  { %227 = vrot.lane.b32.xlu0 %v221_v29, %s440_s26 }
 0x19f   :  { %v226_v30 = vpop.permute.xlu0 %225 }
 0x1a0   :  { %232 = vst.msk [vmem:[#allocation11] sm:$0xff] %vm231_vm3, %v226_v30 }
 0x1a7   :  { %v228_v31 = vpop.permute.xlu0 %227 }
 0x1a8   :  { %234 = vst.msk [vmem:[#allocation11 + $0x8] sm:$0x3] %vm233_vm4, %v228_v31 }
 0x1a9   :  { %247 = dma.vmem_to_hbm [thread:$0]  %s240_s28, 256, %s242_s8, [#allocation4], %s434_s9, %s434_s9, %s435_s10  }
 0x1aa   :  { %431 = dma.done.wait [#allocation4], 256  }
 0x1ab   :  { %432 = vsyncadd [#allocation4], 4294967040 }
 0x1ac   :  { %252 = vsyncpa [#allocation3], 1 }
 0x1ad   :  { %253 = vsyncpa [#allocation6], 1 }
 0x1ae   :  { %254 = vsyncpa [#allocation9], 1 }
 0x1af   :  { %255 = vsyncpa [#allocation4], 1 }

</bundles_post_ra>
